<compile_context>
chip_gen: v7x
topology: tpu7x:2x2x1
jax: 0.10.0
libtpu: 0.0.40
codegen_flags: <defaults>
</compile_context>

<pallas_src>
import functools

import jax
import jax.numpy as jnp
from jax.experimental import pallas as pl
from jax.experimental.pallas import tpu as pltpu

ACTION_SIZE = 4
RAY_BLOCKS = 7
RAY_BLOCK_SIZE = 5
VELOCITY_SIZE = 2
STATE_SIZE = RAY_BLOCK_SIZE * RAY_BLOCKS + VELOCITY_SIZE  # 37

FC1_UNITS = 64
FC2_UNITS = 64

PAD_HID = 128  # 64 -> 128 lane-dense hidden width (kept at 128: bandwidth-bound)


def _round_up(x, m):
    return (x + m - 1) // m * m


def qnetwork_kernel(x_ref, w1_ref, b1_ref, w2_ref, b2_ref, w3_ref, b3_ref, o_ref):
    wdt = w1_ref.dtype
    x = x_ref[...]                                   # (tm, 37) compute dtype
    # fc1 + relu (MXU dot, f32 accumulation; elementwise in f32)
    h1 = jnp.dot(x, w1_ref[...], preferred_element_type=jnp.float32)
    h1 = jnp.maximum(h1 + b1_ref[...], 0.0)
    # fc2 + relu
    h2 = jnp.dot(h1.astype(wdt), w2_ref[...], preferred_element_type=jnp.float32)
    h2 = jnp.maximum(h2 + b2_ref[...], 0.0)
    # fc3 (no activation) -> narrow (tm, 4) store
    out = jnp.dot(h2.astype(wdt), w3_ref[...], preferred_element_type=jnp.float32)
    o_ref[...] = (out + b3_ref[...]).astype(o_ref.dtype)


@functools.partial(jax.jit, static_argnames=("block_m",))
def qnetwork_forward(state, padded_params, *, block_m=512):
    """state: (B, STATE_SIZE) float32. padded_params: output of prepare_params."""
    B = state.shape[0]
    w1, b1 = padded_params["w1"], padded_params["b1"]
    w2, b2 = padded_params["w2"], padded_params["b2"]
    w3, b3 = padded_params["w3"], padded_params["b3"]
    cdt = w1.dtype

    # Sublane packing multiple: 8 rows for f32, 16 for bf16.
    sub = 8 * (4 // jnp.dtype(cdt).itemsize)

    # Align the batch only to the sublane multiple (never to the tile size).
    b_al = _round_up(B, sub)
    x = state.astype(cdt)
    if b_al != B:
        x = jnp.pad(x, ((0, b_al - B), (0, 0)))      # tiny, fuses under jit

    tm = min(block_m, b_al)                          # multiple of `sub`
    grid = pl.cdiv(b_al, tm)                         # partial last block OK

    # Weights/biases: constant index_map -> fetched once, resident in VMEM.
    resident = lambda a: pl.BlockSpec(a.shape, lambda i: (0,) * a.ndim)

    out = pl.pallas_call(
        qnetwork_kernel,
        out_shape=jax.ShapeDtypeStruct((b_al, ACTION_SIZE), jnp.float32),
        grid=(grid,),
        in_specs=[
            # Unpadded state tile streams per grid step (last dim == full dim).
            pl.BlockSpec((tm, STATE_SIZE), lambda i: (i, 0)),
            resident(w1), resident(b1),
            resident(w2), resident(b2),
            resident(w3), resident(b3),
        ],
        out_specs=pl.BlockSpec((tm, ACTION_SIZE), lambda i: (i, 0)),
        compiler_params=pltpu.CompilerParams(
            dimension_semantics=("parallel",),       # megacore sharding on v7x
        ),
    )(x, w1, b1, w2, b2, w3, b3)

    return out[:B]


def init_params(seed=0):
    """Deterministic init mimicking PyTorch nn.Linear default:
    U(-1/sqrt(fan_in), 1/sqrt(fan_in)) for weight and bias.
    Weights stored transposed: (in_features, out_features)."""
    key = jax.random.PRNGKey(seed)
    ks = jax.random.split(key, 6)

    def linear(kw, kb, fan_in, fan_out):
        bound = 1.0 / jnp.sqrt(jnp.float32(fan_in))
        w = jax.random.uniform(kw, (fan_in, fan_out), jnp.float32, -bound, bound)
        b = jax.random.uniform(kb, (1, fan_out), jnp.float32, -bound, bound)
        return w, b

    w1, b1 = linear(ks[0], ks[1], STATE_SIZE, FC1_UNITS)
    w2, b2 = linear(ks[2], ks[3], FC1_UNITS, FC2_UNITS)
    w3, b3 = linear(ks[4], ks[5], FC2_UNITS, ACTION_SIZE)
    return {"w1": w1, "b1": b1, "w2": w2, "b2": b2, "w3": w3, "b3": b3}


def prepare_params(params, compute_dtype=jnp.bfloat16):
    """Zero-pad hidden dims ONCE to 128 lanes and cast weights to the compute
    dtype (bf16 default: native MXU dtype on v5e/v6e/v7x and half the weight
    bytes; f32 accumulation keeps numerics tight). Biases stay f32.
    w1 keeps its 37-row contraction dim; w3 keeps its 4-wide output."""
    def pad(a, shape):
        out = jnp.zeros(shape, dtype=jnp.float32)
        return out.at[tuple(slice(0, s) for s in a.shape)].set(a)

    w1 = pad(params["w1"], (STATE_SIZE, PAD_HID)).astype(compute_dtype)   # (37, 128)
    w2 = pad(params["w2"], (PAD_HID, PAD_HID)).astype(compute_dtype)      # (128, 128)
    w3 = pad(params["w3"], (PAD_HID, ACTION_SIZE)).astype(compute_dtype)  # (128, 4)
    b1 = pad(params["b1"], (1, PAD_HID))                                  # f32
    b2 = pad(params["b2"], (1, PAD_HID))
    b3 = params["b3"].astype(jnp.float32)                                 # (1, 4)
    return {"w1": w1, "b1": b1, "w2": w2, "b2": b2, "w3": w3, "b3": b3}


def reference_forward(state, params):
    h1 = jnp.maximum(state @ params["w1"] + params["b1"], 0.0)
    h2 = jnp.maximum(h1 @ params["w2"] + params["b2"], 0.0)
    return h2 @ params["w3"] + params["b3"]


if __name__ == "__main__":
    params = init_params(seed=0)

    # Small batch, f32 compute path: matches the pure-JAX reference tightly.
    batch = 8
    state = jax.random.normal(jax.random.PRNGKey(0), (batch, STATE_SIZE), jnp.float32)
    ref = reference_forward(state, params)

    padded_f32 = prepare_params(params, compute_dtype=jnp.float32)
    out_f32 = jax.block_until_ready(qnetwork_forward(state, padded_f32))
    assert out_f32.shape == (batch, ACTION_SIZE)
    assert jnp.allclose(out_f32, ref, atol=1e-5, rtol=1e-5)

    # Default bf16 compute path (halves the dominant HBM read stream).
    padded = prepare_params(params)  # bf16 weights, f32 biases/accumulation
    out_bf16 = jax.block_until_ready(qnetwork_forward(state, padded))
    assert out_bf16.shape == (batch, ACTION_SIZE)
    assert jnp.allclose(out_bf16, ref, atol=5e-2, rtol=5e-2)

    # Replay-buffer sized, non-divisible batch: exercises the cdiv grid,
    # the partial last block, and the multi-step pipelined/parallel path.
    big_batch = 1333
    state_big = jax.random.normal(jax.random.PRNGKey(1), (big_batch, STATE_SIZE), jnp.float32)
    out_big = jax.block_until_ready(qnetwork_forward(state_big, padded))
    ref_big = reference_forward(state_big, params)
    assert out_big.shape == (big_batch, ACTION_SIZE)
    assert jnp.allclose(out_big, ref_big, atol=5e-2, rtol=5e-2)

    print("KERNEL_OK")
</pallas_src>

<mosaic_0001>
module attributes {stable_mosaic.version = 11 : i64} {
  func.func @qnetwork_kernel(%arg0: i32, %arg1: memref<8x37xf32, #tpu.memory_space<vmem>>, %arg2: memref<37x128xf32, #tpu.memory_space<vmem>>, %arg3: memref<1x128xf32, #tpu.memory_space<vmem>>, %arg4: memref<128x128xf32, #tpu.memory_space<vmem>>, %arg5: memref<1x128xf32, #tpu.memory_space<vmem>>, %arg6: memref<128x4xf32, #tpu.memory_space<vmem>>, %arg7: memref<1x4xf32, #tpu.memory_space<vmem>>, %arg8: memref<8x4xf32, #tpu.memory_space<vmem>>) attributes {dimension_semantics = [#tpu.dimension_semantics<parallel>], iteration_bounds = array<i64: 1>, scalar_prefetch = 0 : i64, scratch_operands = 0 : i64, tpu.core_type = #tpu.core_type<tc>, window_params = [{transform_indices = @transform_0, window_bounds = array<i64: 8, 37>}, {pipeline_mode = #tpu.pipeline_mode<synchronous>, transform_indices = @transform_1, window_bounds = array<i64: 37, 128>}, {pipeline_mode = #tpu.pipeline_mode<synchronous>, transform_indices = @transform_2, window_bounds = array<i64: 1, 128>}, {pipeline_mode = #tpu.pipeline_mode<synchronous>, transform_indices = @transform_3, window_bounds = array<i64: 128, 128>}, {pipeline_mode = #tpu.pipeline_mode<synchronous>, transform_indices = @transform_4, window_bounds = array<i64: 1, 128>}, {pipeline_mode = #tpu.pipeline_mode<synchronous>, transform_indices = @transform_5, window_bounds = array<i64: 128, 4>}, {pipeline_mode = #tpu.pipeline_mode<synchronous>, transform_indices = @transform_6, window_bounds = array<i64: 1, 4>}, {transform_indices = @transform_7, window_bounds = array<i64: 8, 4>}]} {
    %c0 = arith.constant 0 : index
    %c0_0 = arith.constant 0 : index
    %0 = vector.load %arg1[%c0, %c0_0] : memref<8x37xf32, #tpu.memory_space<vmem>>, vector<8x37xf32>
    %c0_1 = arith.constant 0 : index
    %c0_2 = arith.constant 0 : index
    %1 = vector.load %arg2[%c0_1, %c0_2] : memref<37x128xf32, #tpu.memory_space<vmem>>, vector<37x128xf32>
    %cst = arith.constant dense<0.000000e+00> : vector<8x128xf32>
    %2 = tpu.matmul %0, %1, %cst {dimension_numbers = #tpu.dot_dimension_numbers<[1], [0], [0], [1], [0, 0, 1, 1], [], []>} : vector<8x37xf32>, vector<37x128xf32>, vector<8x128xf32> -> vector<8x128xf32>
    %c0_3 = arith.constant 0 : index
    %c0_4 = arith.constant 0 : index
    %3 = vector.load %arg3[%c0_3, %c0_4] : memref<1x128xf32, #tpu.memory_space<vmem>>, vector<1x128xf32>
    %4 = vector.broadcast %3 : vector<1x128xf32> to vector<8x128xf32>
    %5 = arith.addf %2, %4 : vector<8x128xf32>
    %cst_5 = arith.constant 0.000000e+00 : f32
    %6 = vector.broadcast %cst_5 : f32 to vector<8x128xf32>
    %7 = arith.maximumf %5, %6 : vector<8x128xf32>
    %c0_6 = arith.constant 0 : index
    %c0_7 = arith.constant 0 : index
    %8 = vector.load %arg4[%c0_6, %c0_7] : memref<128x128xf32, #tpu.memory_space<vmem>>, vector<128x128xf32>
    %cst_8 = arith.constant dense<0.000000e+00> : vector<8x128xf32>
    %9 = tpu.matmul %7, %8, %cst_8 {dimension_numbers = #tpu.dot_dimension_numbers<[1], [0], [0], [1], [0, 0, 1, 1], [], []>} : vector<8x128xf32>, vector<128x128xf32>, vector<8x128xf32> -> vector<8x128xf32>
    %c0_9 = arith.constant 0 : index
    %c0_10 = arith.constant 0 : index
    %10 = vector.load %arg5[%c0_9, %c0_10] : memref<1x128xf32, #tpu.memory_space<vmem>>, vector<1x128xf32>
    %11 = vector.broadcast %10 : vector<1x128xf32> to vector<8x128xf32>
    %12 = arith.addf %9, %11 : vector<8x128xf32>
    %cst_11 = arith.constant 0.000000e+00 : f32
    %13 = vector.broadcast %cst_11 : f32 to vector<8x128xf32>
    %14 = arith.maximumf %12, %13 : vector<8x128xf32>
    %c0_12 = arith.constant 0 : index
    %c0_13 = arith.constant 0 : index
    %15 = vector.load %arg6[%c0_12, %c0_13] : memref<128x4xf32, #tpu.memory_space<vmem>>, vector<128x4xf32>
    %cst_14 = arith.constant dense<0.000000e+00> : vector<8x4xf32>
    %16 = tpu.matmul %14, %15, %cst_14 {dimension_numbers = #tpu.dot_dimension_numbers<[1], [0], [0], [1], [0, 0, 1, 1], [], []>} : vector<8x128xf32>, vector<128x4xf32>, vector<8x4xf32> -> vector<8x4xf32>
    %c0_15 = arith.constant 0 : index
    %c0_16 = arith.constant 0 : index
    %17 = vector.load %arg7[%c0_15, %c0_16] : memref<1x4xf32, #tpu.memory_space<vmem>>, vector<1x4xf32>
    %18 = vector.broadcast %17 : vector<1x4xf32> to vector<8x4xf32>
    %19 = arith.addf %16, %18 : vector<8x4xf32>
    %c0_17 = arith.constant 0 : index
    %c0_18 = arith.constant 0 : index
    %20 = vector.load %arg8[%c0_17, %c0_18] : memref<8x4xf32, #tpu.memory_space<vmem>>, vector<8x4xf32>
    tpu.vector_store %arg8[%c0_17, %c0_18], %19 {strides = array<i32>} : memref<8x4xf32, #tpu.memory_space<vmem>>, vector<8x4xf32>,
    return
  }
  func.func @transform_0(%arg0: i32) -> (i32, i32) {
    %c0_i32 = arith.constant 0 : i32
    %c0_i32_0 = arith.constant 0 : i32
    return %arg0, %c0_i32 : i32, i32
  }
  func.func @transform_1(%arg0: i32) -> (i32, i32) {
    %c0_i32 = arith.constant 0 : i32
    %c0_i32_0 = arith.constant 0 : i32
    %c0_i32_1 = arith.constant 0 : i32
    return %c0_i32, %c0_i32_0 : i32, i32
  }
  func.func @transform_2(%arg0: i32) -> (i32, i32) {
    %c0_i32 = arith.constant 0 : i32
    %c0_i32_0 = arith.constant 0 : i32
    %c0_i32_1 = arith.constant 0 : i32
    return %c0_i32, %c0_i32_0 : i32, i32
  }
  func.func @transform_3(%arg0: i32) -> (i32, i32) {
    %c0_i32 = arith.constant 0 : i32
    %c0_i32_0 = arith.constant 0 : i32
    %c0_i32_1 = arith.constant 0 : i32
    return %c0_i32, %c0_i32_0 : i32, i32
  }
  func.func @transform_4(%arg0: i32) -> (i32, i32) {
    %c0_i32 = arith.constant 0 : i32
    %c0_i32_0 = arith.constant 0 : i32
    %c0_i32_1 = arith.constant 0 : i32
    return %c0_i32, %c0_i32_0 : i32, i32
  }
  func.func @transform_5(%arg0: i32) -> (i32, i32) {
    %c0_i32 = arith.constant 0 : i32
    %c0_i32_0 = arith.constant 0 : i32
    %c0_i32_1 = arith.constant 0 : i32
    return %c0_i32, %c0_i32_0 : i32, i32
  }
  func.func @transform_6(%arg0: i32) -> (i32, i32) {
    %c0_i32 = arith.constant 0 : i32
    %c0_i32_0 = arith.constant 0 : i32
    %c0_i32_1 = arith.constant 0 : i32
    return %c0_i32, %c0_i32_0 : i32, i32
  }
  func.func @transform_7(%arg0: i32) -> (i32, i32) {
    %c0_i32 = arith.constant 0 : i32
    %c0_i32_0 = arith.constant 0 : i32
    return %arg0, %c0_i32 : i32, i32
  }
}

</mosaic_0001>

<bundles_post_ra>
// kernel: qnetwork_forward.1
= control target key start
LH: loop header
LB: loop body
LE: loop exit
PB: predicated region body
PF: predicated region fallthrough
CT: control target
= control target key end

     0   :  { %12 = vsyncpa [#allocation3], 0  ;;  %s538_s24 = smov [#allocation2]   ;;  %s728_s0 = inlined_call_operand.vmem [shape: f32[8,37], index: 0, kind: input, shape index: {}]   ;;  %s729_s1 = inlined_call_operand.hbm [shape: f32[37,128], index: 1, kind: input, shape index: {}]   ;;  %s730_s2 = inlined_call_operand.vmem [shape: f32[1,128], index: 2, kind: input, shape index: {}]   ;;  %s731_s3 = inlined_call_operand.vmem [shape: f32[128,128], index: 3, kind: input, shape index: {}]   ;;  %s732_s4 = inlined_call_operand.vmem [shape: f32[1,128], index: 4, kind: input, shape index: {}]   ;;  %s733_s5 = inlined_call_operand.vmem [shape: f32[128,4], index: 5, kind: input, shape index: {}]   ;;  %s734_s6 = inlined_call_operand.vmem [shape: f32[1,4], index: 6, kind: input, shape index: {}]   ;;  %s735_s7 = inlined_call_operand.vmem [shape: f32[8,4], index: 7, kind: output, shape index: {}]  }
   0x1   :  { %s20_s25 = sshll.u32 %s538_s24, 4  ;;  %s514_s28 = scalar_lea.hbm %s729_s1, 640  ;;  %s21_s25 = int_to_ptr.vmem [resolvable:$true] %s20_s25 }
   0x2   :  { %p515_p0 = scmp.ne.s32.totalorder %s729_s1, %s514_s28  ;;  %p518_p1 = scmp.lt.u32.totalorder %s514_s28, %s729_s1 }
   0x4   :  { %p520_p2 = pnand %p518_p1, %p515_p0 }
   0x6   :  { %523 = shalt.err (!%p520_p2)
}
   0x7   :  { %s524_s10 = scalar_lea.vmem %s21_s25, 640  ;;  %p529_p4 = scmp.lt.s32.totalorder %s21_s25, %s21_s25 }
   0x8   :  { %p525_p3 = scmp.ne.s32.totalorder %s21_s25, %s524_s10  ;;  %p530_p5 = scmp.lt.s32.totalorder %s524_s10, %s524_s10 }
   0xa   :  { %p531_p6 = por %p530_p5, %p529_p4 }
   0xc   :  { %p532_p7 = pnand %p531_p6, %p525_p3 }
   0xe   :  { %535 = shalt.err (!%p532_p7)
}
   0xf   :  { %s539_s11 = smov 128   ;;  %s540_s12 = smov 8  }
  0x10   :  { %26 = dma.hbm_to_vmem [thread:$0]  %s729_s1, 640, %s21_s25, [#allocation3], %s539_s11, %s539_s11, %s540_s12  }
  0x11   :  { %536 = dma.done.wait [#allocation3], 640  }
  0x12   :  { %537 = vsyncadd [#allocation3], 4294966656  ;;  %v541_v0 = vmov 0.0|0.0   ;;  %vm542_vm0 = vmmov 0   ;;  %v543_v1 = vmov 0.0   ;;  %v41_v2 = vld [vmem:[#allocation2] sm:$0xff] }
  0x13   :  { %454 = vmatprep.subr.bf16.mxu0 %v541_v0  ;;  %381 = vmatprep.mubr.msk.f32.mxu0 %vm542_vm0, %v543_v1  ;;  %v42_v3 = vld [vmem:[#allocation2 + $0x8] sm:$0xff]  ;;  %v43_v4 = vld [vmem:[#allocation2 + $0x10] sm:$0xff]  ;;  %v44_v6 = vld [vmem:[#allocation2 + $0x18] sm:$0xff]  ;;  %vm57_vm1 = vcmask 1044480   ;;  %vm53_vm2 = vcmask 302080   ;;  %vm319_vm3 = vcmask 31744  }
  0x14   :  { %460 = vmatprep.subr.bf16.mxu1 %v541_v0  ;;  %416 = vmatprep.mubr.msk.f32.mxu1 %vm542_vm0, %v543_v1  ;;  %v455_v5 = vpack.c.bf16 %v42_v3, %v41_v2  ;;  %v132_v7 = vld [vmem:[%s731_s3] sm:$0xff]  ;;  %v133_v8 = vld [vmem:[%s731_s3 + $0x8] sm:$0xff]  ;;  %v134_v9 = vld [vmem:[%s731_s3 + $0x10] sm:$0xff]  ;;  %v458_v10 = vpack.c.bf16 %v44_v6, %v43_v4 }
  0x15   :  { %v461_v11 = vpack.c.bf16 %v133_v8, %v132_v7  ;;  %v135_v12 = vld [vmem:[%s731_s3 + $0x18] sm:$0xff]  ;;  %v136_v14 = vld [vmem:[%s731_s3 + $0x20] sm:$0xff]  ;;  %v137_v15 = vld [vmem:[%s731_s3 + $0x28] sm:$0xff] }
  0x16   :  { %456 = vmatpush3.bf16.msra.mxu0 %v455_v5  ;;  %v464_v13 = vpack.c.bf16 %v135_v12, %v134_v9  ;;  %v45_v16 = vld [vmem:[#allocation2 + $0x20] sm:$0x1f]  ;;  %v467_v18 = vpack.c.bf16 %v137_v15, %v136_v14  ;;  %v138_v19 = vld [vmem:[%s731_s3 + $0x30] sm:$0xff]  ;;  %v139_v20 = vld [vmem:[%s731_s3 + $0x38] sm:$0xff] }
  0x17   :  { %457 = vmatprep.subr.bf16.mxu0 %v541_v0  ;;  %462 = vmatpush3.bf16.msra.mxu1 %v461_v11  ;;  %v40_v17 = vld [vmem:[%s728_s0] sm:$0xff]  ;;  %v470_v21 = vpack.c.bf16 %v139_v20, %v138_v19  ;;  %v141_v23 = vld [vmem:[%s731_s3 + $0x48] sm:$0xff]  ;;  %v142_v25 = vld [vmem:[%s731_s3 + $0x50] sm:$0xff] }
  0x18   :  { %463 = vmatprep.subr.bf16.mxu1 %v541_v0  ;;  %v140_v22 = vld [vmem:[%s731_s3 + $0x40] sm:$0xff]  ;;  %v143_v26 = vld [vmem:[%s731_s3 + $0x58] sm:$0xff]  ;;  %v145_v29 = vld [vmem:[%s731_s3 + $0x68] sm:$0xff] }
  0x19   :  { %v473_v24 = vpack.c.bf16 %v141_v23, %v140_v22  ;;  %v476_v27 = vpack.c.bf16 %v143_v26, %v142_v25  ;;  %v144_v28 = vld [vmem:[%s731_s3 + $0x60] sm:$0xff]  ;;  %v146_v31 = vld [vmem:[%s731_s3 + $0x70] sm:$0xff]  ;;  %v147_v32 = vld [vmem:[%s731_s3 + $0x78] sm:$0xff] }
  0x1a   :  { %459 = vmatpush3.bf16.msra.mxu0 %v458_v10  ;;  %v479_v30 = vpack.c.bf16 %v145_v29, %v144_v28  ;;  %v482_v33 = vpack.c.bf16 %v147_v32, %v146_v31  ;;  %v226_v34 = vld [vmem:[%s733_s5] sm:$0xff]  ;;  %v227_v35 = vld [vmem:[%s733_s5 + $0x8] sm:$0xff]  ;;  %v228_v36 = vld [vmem:[%s733_s5 + $0x10] sm:$0xff] }
  0x1b   :  { %379 = vmatprep.subr.mxu0 %v543_v1  ;;  %465 = vmatpush3.bf16.msra.mxu1 %v464_v13  ;;  %v485_v37 = vpack.c.bf16 %v227_v35, %v226_v34  ;;  %v229_v38 = vld [vmem:[%s733_s5 + $0x18] sm:$0xff]  ;;  %v230_v40 = vld [vmem:[%s733_s5 + $0x20] sm:$0xff]  ;;  %v231_v41 = vld [vmem:[%s733_s5 + $0x28] sm:$0xff] }
  0x1c   :  { %466 = vmatprep.subr.bf16.mxu1 %v541_v0  ;;  %v488_v39 = vpack.c.bf16 %v229_v38, %v228_v36  ;;  %v491_v42 = vpack.c.bf16 %v231_v41, %v230_v40  ;;  %v232_v43 = vld [vmem:[%s733_s5 + $0x30] sm:$0xff]  ;;  %v233_v44 = vld [vmem:[%s733_s5 + $0x38] sm:$0xff]  ;;  %v234_v46 = vld [vmem:[%s733_s5 + $0x40] sm:$0xff] }
  0x1d   :  { %v494_v45 = vpack.c.bf16 %v233_v44, %v232_v43  ;;  %v235_v47 = vld [vmem:[%s733_s5 + $0x48] sm:$0xff]  ;;  %v236_v49 = vld [vmem:[%s733_s5 + $0x50] sm:$0xff]  ;;  %v237_v50 = vld [vmem:[%s733_s5 + $0x58] sm:$0xff] }
  0x1e   :  { %380 = vmatpush3.msk.msra.mxu0 %vm57_vm1, %v45_v16  ;;  %v497_v48 = vpack.c.bf16 %v235_v47, %v234_v46  ;;  %v500_v51 = vpack.c.bf16 %v237_v50, %v236_v49  ;;  %v238_v52 = vld [vmem:[%s733_s5 + $0x60] sm:$0xff]  ;;  %v239_v53 = vld [vmem:[%s733_s5 + $0x68] sm:$0xff]  ;;  %v240_v60 = vld [vmem:[%s733_s5 + $0x70] sm:$0xff] }
  0x1f   :  { %382 = vmatmul.mubr.msk.f32.vlgmr.msra.gmra.mrb[0].mxu0 %vm53_vm2, %v40_v17  ;;  %484 = vmatprep.subr.bf16.mxu0 %v541_v0  ;;  %v503_v54 = vpack.c.bf16 %v239_v53, %v238_v52  ;;  %v326_v55 = vld [vmem:[%s730_s2] ss:$0 sm:$0xff]  ;;  %v241_v61 = vld [vmem:[%s733_s5 + $0x78] sm:$0xff] }
  0x20   :  { %468 = vmatpush3.bf16.msra.mxu1 %v467_v18  ;;  %451 = vmatprep.mubr.msk.f32.mxu0 %vm542_vm0, %v543_v1  ;;  %v506_v62 = vpack.c.bf16 %v241_v61, %v240_v60  ;;  %v329_v63 = vld [vmem:[%s732_s4] ss:$0 sm:$0xff] }
  0x21   :  { %469 = vmatprep.subr.bf16.mxu1 %v541_v0  ;;  %486 = vmatpush3.bf16.msra.mxu0 %v485_v37  ;;  %v330_v4 = vld [vmem:[%s734_s6] ss:$0 sm:$0xff] }
  0x22   :  { %487 = vmatprep.subr.bf16.mxu0 %v541_v0 }
  0x24   :  { %471 = vmatpush3.bf16.msra.mxu1 %v470_v21 }
  0x25   :  { %472 = vmatprep.subr.bf16.mxu1 %v541_v0  ;;  %489 = vmatpush3.bf16.msra.mxu0 %v488_v39 }
  0x26   :  { %490 = vmatprep.subr.bf16.mxu0 %v541_v0 }
  0x28   :  { %474 = vmatpush3.bf16.msra.mxu1 %v473_v24 }
  0x29   :  { %475 = vmatprep.subr.bf16.mxu1 %v541_v0  ;;  %492 = vmatpush3.bf16.msra.mxu0 %v491_v42 }
  0x2a   :  { %493 = vmatprep.subr.bf16.mxu0 %v541_v0 }
  0x2c   :  { %477 = vmatpush3.bf16.msra.mxu1 %v476_v27 }
  0x2d   :  { %478 = vmatprep.subr.bf16.mxu1 %v541_v0  ;;  %495 = vmatpush3.bf16.msra.mxu0 %v494_v45 }
  0x2e   :  { %496 = vmatprep.subr.bf16.mxu0 %v541_v0 }
  0x30   :  { %480 = vmatpush3.bf16.msra.mxu1 %v479_v30 }
  0x31   :  { %481 = vmatprep.subr.bf16.mxu1 %v541_v0  ;;  %498 = vmatpush3.bf16.msra.mxu0 %v497_v48 }
  0x32   :  { %499 = vmatprep.subr.bf16.mxu0 %v541_v0 }
  0x34   :  { %483 = vmatpush3.bf16.msra.mxu1 %v482_v33 }
  0x35   :  { %501 = vmatpush3.bf16.msra.mxu0 %v500_v51 }
  0x36   :  { %502 = vmatprep.subr.bf16.mxu0 %v541_v0 }
  0x39   :  { %504 = vmatpush3.bf16.msra.mxu0 %v503_v54 }
  0x3a   :  { %505 = vmatprep.subr.bf16.mxu0 %v541_v0 }
  0x3d   :  { %507 = vmatpush3.bf16.msra.mxu0 %v506_v62 }
  0xf2   :  { %v127_v56 = vpop.f32.mrb[0].mxu0 }
  0xf3   :  { %v128_v57 = vadd.f32 %v326_v55, %v127_v56  ;;  %v383_v58 = vpop.f32.mrb[1].mxu0 }
  0xf5   :  { %v131_v59 = vmax.f32 %v128_v57, 0.0 }
  0xf7   :  { %417 = vmatmul.mubr.f32.vlgmr.msra.gmra.mrb[0].mxu1 %v131_v59 }
 0x1ca   :  { %v221_v0 = vpop.f32.mrb[0].mxu1 }
 0x1cb   :  { %v222_v1 = vadd.f32 %v329_v63, %v221_v0  ;;  %v418_v2 = vpop.f32.mrb[1].mxu1 }
 0x1cd   :  { %v225_v3 = vmax.f32 %v222_v1, 0.0 }
 0x1cf   :  { %452 = vmatmul.mubr.f32.vlgmr.msra.gmra.mrb[2].mxu0 %v225_v3 }
 0x2a2   :  { %v315_v5 = vpop.f32.mrb[2].mxu0 }
 0x2a3   :  { %v316_v6 = vadd.f32 %v330_v4, %v315_v5  ;;  %v453_v7 = vpop.f32.mrb[3].mxu0 }
 0x2a5   :  { %320 = vst.msk [vmem:[%s735_s7] sm:$0xff] %vm319_vm3, %v316_v6 }
 0x2a6   :  { %325 = vsyncpa [#allocation3], 1 }

</bundles_post_ra>
